<compile_context>
chip_gen: v5e
topology: v5e:2x2
jax: 0.10.0
libtpu: 0.0.40
codegen_flags: <defaults>
</compile_context>

<pallas_src>
import jax
import jax.numpy as jnp
from jax.experimental import pallas as pl
from jax.experimental.pallas import tpu as pltpu


def _gcn_fused_kernel(a_ref, x_ref, w_ref, b_ref, o_ref, acc_ref):
    """out_tile = ((A_tile @ X) @ W) + b, with the A@X reduction K-tiled over grid axis 1."""
    k = pl.program_id(1)

    @pl.when(k == 0)
    def _():
        acc_ref[...] = jnp.zeros_like(acc_ref)

    # message passing partial sum: A[tn, tk] @ X[tk, F_in]  (MXU, f32 accumulate)
    acc_ref[...] += jnp.dot(
        a_ref[...].astype(jnp.float32),
        x_ref[...],
        preferred_element_type=jnp.float32,
    )

    @pl.when(k == pl.num_programs(1) - 1)
    def _():
        # linear layer on the aggregated features (second MXU matmul) + bias
        o_ref[...] = (
            jnp.dot(acc_ref[...], w_ref[...], preferred_element_type=jnp.float32)
            + b_ref[...]
        ).astype(o_ref.dtype)


def _gcn_agg_kernel(a_ref, h_ref, b_ref, o_ref, acc_ref):
    """out_tile = (A_tile @ H) + b where H = X @ W was pre-applied (F_out < F_in path)."""
    k = pl.program_id(1)

    @pl.when(k == 0)
    def _():
        acc_ref[...] = jnp.zeros_like(acc_ref)

    acc_ref[...] += jnp.dot(
        a_ref[...].astype(jnp.float32),
        h_ref[...],
        preferred_element_type=jnp.float32,
    )

    @pl.when(k == pl.num_programs(1) - 1)
    def _():
        o_ref[...] = (acc_ref[...] + b_ref[...]).astype(o_ref.dtype)


def _round_up(x, m):
    return (x + m - 1) // m * m


def gcn_layer(A, X, W_t, b, *, tn=256, tk=512):
    """out = (A @ X) @ W_t + b  (==  DGL update_all(copy_u, sum) followed by nn.Linear)."""
    N = A.shape[0]
    F_in = X.shape[1]
    F_out = W_t.shape[1]
    assert A.shape == (N, N) and W_t.shape == (F_in, F_out)

    # Clamp tiles to the (padded) problem size while keeping (8, 128) alignment.
    tn = min(tn, _round_up(N, 8))      # row tile of A / out  (sublane axis)
    tk = min(tk, _round_up(N, 128))    # neighbor-reduction tile (lane axis of A block)
    assert tn % 8 == 0 and tk % 128 == 0

    n_rows = _round_up(N, tn)          # padded output rows
    n_cols = _round_up(N, tk)          # padded reduction dim
    f_in_p = _round_up(F_in, 128)      # lane-dense intermediate width
    f_out_p = _round_up(F_out, 128)    # lane-dense output width (no masked stores)

    # Data-driven association order: (A@X)@W vs A@(X@W) -> minimize the N^2 term.
    fuse_w = f_out_p >= f_in_p

    # Pad (+ cast A to bf16: exact for 0/1, halves HBM bytes of the dominant array).
    A_p = jnp.zeros((n_rows, n_cols), jnp.bfloat16).at[:N, :N].set(
        A.astype(jnp.bfloat16)
    )
    b_p = jnp.zeros((1, f_out_p), jnp.float32).at[:, :F_out].set(
        jnp.asarray(b, jnp.float32).reshape(1, F_out)
    )

    grid = (n_rows // tn, n_cols // tk)
    a_spec = pl.BlockSpec((tn, tk), lambda i, k: (i, k))
    b_spec = pl.BlockSpec((1, f_out_p), lambda i, k: (0, 0))
    o_spec = pl.BlockSpec((tn, f_out_p), lambda i, k: (i, 0))
    cparams = pltpu.CompilerParams(
        dimension_semantics=("parallel", "arbitrary"),
        vmem_limit_bytes=48 * 1024 * 1024,
    )

    if fuse_w:
        X_p = jnp.zeros((n_cols, f_in_p), jnp.float32).at[:N, :F_in].set(
            X.astype(jnp.float32)
        )
        W_p = jnp.zeros((f_in_p, f_out_p), jnp.float32).at[:F_in, :F_out].set(
            W_t.astype(jnp.float32)
        )
        cost = pl.CostEstimate(
            flops=2 * n_rows * n_cols * f_in_p + 2 * n_rows * f_in_p * f_out_p,
            transcendentals=0,
            bytes_accessed=int(
                A_p.size * 2 + X_p.size * 4 + W_p.size * 4 + b_p.size * 4
                + n_rows * f_out_p * 4
            ),
        )
        out = pl.pallas_call(
            _gcn_fused_kernel,
            out_shape=jax.ShapeDtypeStruct((n_rows, f_out_p), jnp.float32),
            grid_spec=pltpu.PrefetchScalarGridSpec(
                num_scalar_prefetch=0,
                grid=grid,
                in_specs=[
                    a_spec,                                              # A tile [tn, tk]
                    pl.BlockSpec((tk, f_in_p), lambda i, k: (k, 0)),     # X tile [tk, F_in]
                    pl.BlockSpec((f_in_p, f_out_p), lambda i, k: (0, 0)),  # W (resident)
                    b_spec,                                              # bias (resident)
                ],
                out_specs=o_spec,
                scratch_shapes=[pltpu.VMEM((tn, f_in_p), jnp.float32)],  # agg accumulator
            ),
            compiler_params=cparams,
            cost_estimate=cost,
        )(A_p, X_p, W_p, b_p)
    else:
        # Pre-apply the linear weight once (small N*F_in*F_out matmul), then A @ H + b.
        H = jnp.dot(
            X.astype(jnp.float32), W_t.astype(jnp.float32),
            preferred_element_type=jnp.float32,
        )
        H_p = jnp.zeros((n_cols, f_out_p), jnp.float32).at[:N, :F_out].set(H)
        cost = pl.CostEstimate(
            flops=2 * n_rows * n_cols * f_out_p,
            transcendentals=0,
            bytes_accessed=int(
                A_p.size * 2 + H_p.size * 4 + b_p.size * 4 + n_rows * f_out_p * 4
            ),
        )
        out = pl.pallas_call(
            _gcn_agg_kernel,
            out_shape=jax.ShapeDtypeStruct((n_rows, f_out_p), jnp.float32),
            grid_spec=pltpu.PrefetchScalarGridSpec(
                num_scalar_prefetch=0,
                grid=grid,
                in_specs=[
                    a_spec,                                              # A tile [tn, tk]
                    pl.BlockSpec((tk, f_out_p), lambda i, k: (k, 0)),    # H tile [tk, F_out]
                    b_spec,                                              # bias (resident)
                ],
                out_specs=o_spec,
                scratch_shapes=[pltpu.VMEM((tn, f_out_p), jnp.float32)],
            ),
            compiler_params=cparams,
            cost_estimate=cost,
        )(A_p, H_p, b_p)

    # Slice off row / lane padding.
    return out[:N, :F_out]


if __name__ == "__main__":
    key = jax.random.PRNGKey(0)
    k_a, k_x, k_w, k_b = jax.random.split(key, 4)

    # small graph: 16 nodes, in_feats=32, out_feats=64
    N, F_in, F_out = 16, 32, 64

    # deterministic random graph (dense adjacency, ~30% edge density)
    A = (jax.random.uniform(k_a, (N, N)) < 0.3).astype(jnp.float32)
    X = jax.random.normal(k_x, (N, F_in), dtype=jnp.float32)

    # nn.Linear(in_feats, out_feats): weight [out, in] stored transposed, bias [out]
    W_t = jax.random.normal(k_w, (F_in, F_out), dtype=jnp.float32) * 0.1
    b = jax.random.normal(k_b, (F_out,), dtype=jnp.float32) * 0.1

    out = gcn_layer(A, X, W_t, b)
    jax.block_until_ready(out)

    # pure-JAX reference of the same forward pass
    ref = (A @ X) @ W_t + b[None, :]
    assert out.shape == (N, F_out)
    assert jnp.allclose(out, ref, atol=1e-4, rtol=1e-4)

    print("KERNEL_OK")
</pallas_src>

<mosaic_0001>
module attributes {stable_mosaic.version = 11 : i64} {
  func.func @_gcn_fused_kernel(%arg0: i32, %arg1: i32, %arg2: memref<16x128xbf16, #tpu.memory_space<vmem>>, %arg3: memref<128x128xf32, #tpu.memory_space<vmem>>, %arg4: memref<128x128xf32, #tpu.memory_space<vmem>>, %arg5: memref<1x128xf32, #tpu.memory_space<vmem>>, %arg6: memref<16x128xf32, #tpu.memory_space<vmem>>, %arg7: memref<16x128xf32, #tpu.memory_space<vmem>>) attributes {dimension_semantics = [#tpu.dimension_semantics<parallel>, #tpu.dimension_semantics<arbitrary>], iteration_bounds = array<i64: 1, 1>, scalar_prefetch = 0 : i64, scratch_operands = 1 : i64, tpu.core_type = #tpu.core_type<tc>, window_params = [{transform_indices = @transform_0, window_bounds = array<i64: 16, 128>}, {transform_indices = @transform_1, window_bounds = array<i64: 128, 128>}, {pipeline_mode = #tpu.pipeline_mode<synchronous>, transform_indices = @transform_2, window_bounds = array<i64: 128, 128>}, {pipeline_mode = #tpu.pipeline_mode<synchronous>, transform_indices = @transform_3, window_bounds = array<i64: 1, 128>}, {transform_indices = @transform_4, window_bounds = array<i64: 16, 128>}]} {
    %c0_i32 = arith.constant 0 : i32
    %0 = arith.cmpi eq, %arg1, %c0_i32 : i32
    %1 = arith.extui %0 : i1 to i32
    %c0_i32_0 = arith.constant 0 : i32
    %2 = arith.cmpi ne, %1, %c0_i32_0 : i32
    scf.if %2 {
      %cst_10 = arith.constant 0.000000e+00 : f32
      %13 = vector.broadcast %cst_10 : f32 to vector<16x128xf32>
      %c0_11 = arith.constant 0 : index
      %c0_12 = arith.constant 0 : index
      %14 = vector.load %arg7[%c0_11, %c0_12] : memref<16x128xf32, #tpu.memory_space<vmem>>, vector<16x128xf32>
      tpu.vector_store %arg7[%c0_11, %c0_12], %13 {strides = array<i32>} : memref<16x128xf32, #tpu.memory_space<vmem>>, vector<16x128xf32>,
    } else {
    }
    %c0 = arith.constant 0 : index
    %c0_1 = arith.constant 0 : index
    %3 = vector.load %arg7[%c0, %c0_1] : memref<16x128xf32, #tpu.memory_space<vmem>>, vector<16x128xf32>
    %c0_2 = arith.constant 0 : index
    %c0_3 = arith.constant 0 : index
    %4 = vector.load %arg2[%c0_2, %c0_3] : memref<16x128xbf16, #tpu.memory_space<vmem>>, vector<16x128xbf16>
    %5 = arith.extf %4 : vector<16x128xbf16> to vector<16x128xf32>
    %c0_4 = arith.constant 0 : index
    %c0_5 = arith.constant 0 : index
    %6 = vector.load %arg3[%c0_4, %c0_5] : memref<128x128xf32, #tpu.memory_space<vmem>>, vector<128x128xf32>
    %cst = arith.constant dense<0.000000e+00> : vector<16x128xf32>
    %7 = tpu.matmul %5, %6, %cst {dimension_numbers = #tpu.dot_dimension_numbers<[1], [0], [0], [1], [0, 0, 1, 1], [], []>} : vector<16x128xf32>, vector<128x128xf32>, vector<16x128xf32> -> vector<16x128xf32>
    %8 = arith.addf %3, %7 : vector<16x128xf32>
    %c0_6 = arith.constant 0 : index
    %c0_7 = arith.constant 0 : index
    %9 = vector.load %arg7[%c0_6, %c0_7] : memref<16x128xf32, #tpu.memory_space<vmem>>, vector<16x128xf32>
    tpu.vector_store %arg7[%c0_6, %c0_7], %8 {strides = array<i32>} : memref<16x128xf32, #tpu.memory_space<vmem>>, vector<16x128xf32>,
    %c0_i32_8 = arith.constant 0 : i32
    %10 = arith.cmpi eq, %arg1, %c0_i32_8 : i32
    %11 = arith.extui %10 : i1 to i32
    %c0_i32_9 = arith.constant 0 : i32
    %12 = arith.cmpi ne, %11, %c0_i32_9 : i32
    scf.if %12 {
      %c0_10 = arith.constant 0 : index
      %c0_11 = arith.constant 0 : index
      %13 = vector.load %arg7[%c0_10, %c0_11] : memref<16x128xf32, #tpu.memory_space<vmem>>, vector<16x128xf32>
      %c0_12 = arith.constant 0 : index
      %c0_13 = arith.constant 0 : index
      %14 = vector.load %arg4[%c0_12, %c0_13] : memref<128x128xf32, #tpu.memory_space<vmem>>, vector<128x128xf32>
      %cst_14 = arith.constant dense<0.000000e+00> : vector<16x128xf32>
      %15 = tpu.matmul %13, %14, %cst_14 {dimension_numbers = #tpu.dot_dimension_numbers<[1], [0], [0], [1], [0, 0, 1, 1], [], []>} : vector<16x128xf32>, vector<128x128xf32>, vector<16x128xf32> -> vector<16x128xf32>
      %c0_15 = arith.constant 0 : index
      %c0_16 = arith.constant 0 : index
      %16 = vector.load %arg5[%c0_15, %c0_16] : memref<1x128xf32, #tpu.memory_space<vmem>>, vector<1x128xf32>
      %17 = vector.broadcast %16 : vector<1x128xf32> to vector<16x128xf32>
      %18 = arith.addf %15, %17 : vector<16x128xf32>
      %c0_17 = arith.constant 0 : index
      %c0_18 = arith.constant 0 : index
      %19 = vector.load %arg6[%c0_17, %c0_18] : memref<16x128xf32, #tpu.memory_space<vmem>>, vector<16x128xf32>
      tpu.vector_store %arg6[%c0_17, %c0_18], %18 {strides = array<i32>} : memref<16x128xf32, #tpu.memory_space<vmem>>, vector<16x128xf32>,
    } else {
    }
    return
  }
  func.func @transform_0(%arg0: i32, %arg1: i32) -> (i32, i32) {
    %c0_i32 = arith.constant 0 : i32
    return %arg0, %arg1 : i32, i32
  }
  func.func @transform_1(%arg0: i32, %arg1: i32) -> (i32, i32) {
    %c0_i32 = arith.constant 0 : i32
    %c0_i32_0 = arith.constant 0 : i32
    return %arg1, %c0_i32 : i32, i32
  }
  func.func @transform_2(%arg0: i32, %arg1: i32) -> (i32, i32) {
    %c0_i32 = arith.constant 0 : i32
    %c0_i32_0 = arith.constant 0 : i32
    %c0_i32_1 = arith.constant 0 : i32
    return %c0_i32, %c0_i32_0 : i32, i32
  }
  func.func @transform_3(%arg0: i32, %arg1: i32) -> (i32, i32) {
    %c0_i32 = arith.constant 0 : i32
    %c0_i32_0 = arith.constant 0 : i32
    %c0_i32_1 = arith.constant 0 : i32
    return %c0_i32, %c0_i32_0 : i32, i32
  }
  func.func @transform_4(%arg0: i32, %arg1: i32) -> (i32, i32) {
    %c0_i32 = arith.constant 0 : i32
    %c0_i32_0 = arith.constant 0 : i32
    return %arg0, %c0_i32 : i32, i32
  }
}

</mosaic_0001>

<bundles_post_ra>
// kernel: tpu_custom_call.1
= control target key start
LH: loop header
LB: loop body
LE: loop exit
PB: predicated region body
PF: predicated region fallthrough
CT: control target
= control target key end

     0   :  { %9 = vsyncpa [#allocation4], 0  ;;  %s394_s0 = inlined_call_operand.hbm [shape: bf16[16,128], index: 0, kind: input, shape index: {}]   ;;  %s395_s1 = inlined_call_operand.hbm [shape: f32[128,128], index: 1, kind: input, shape index: {}]   ;;  %s396_s2 = inlined_call_operand.hbm [shape: f32[128,128], index: 2, kind: input, shape index: {}]   ;;  %s397_s3 = inlined_call_operand.vmem [shape: f32[1,128], index: 3, kind: input, shape index: {}]   ;;  %s398_s4 = inlined_call_operand.hbm [shape: f32[16,128], index: 4, kind: output, shape index: {}]  }
   0x1   :  { %10 = vsyncpa [#allocation7], 0  ;;  %s29_s17 = sshll.u32 %s395_s1, 4  ;;  %s30_s17 = int_to_ptr.hbm [resolvable:$true] %s29_s17 }
   0x2   :  { %11 = vsyncpa [#allocation5], 0  ;;  %s337_s18 = smov [#allocation6]   ;;  %s16_s22 = sshll.u32 %s394_s0, 4  ;;  %s17_s22 = int_to_ptr.hbm [resolvable:$true] %s16_s22 }
   0x3   :  { %s31_s19 = sshll.u32 %s337_s18, 4  ;;  %s338_s23 = smov 128   ;;  %s32_s19 = int_to_ptr.vmem [resolvable:$true] %s31_s19 }
   0x4   :  { %s339_s24 = smov 8   ;;  %s340_s25 = smov [#allocation3]  }
   0x5   :  { %37 = dma.hbm_to_vmem [thread:$0]  %s30_s17, 2048, %s32_s19, [#allocation7], %s338_s23, %s338_s23, %s339_s24  }
   0x6   :  { %s18_s26 = sshll.u32 %s340_s25, 4  ;;  %s341_s1 = smov 64   ;;  %s19_s26 = int_to_ptr.vmem [resolvable:$true] %s18_s26 }
   0x7   :  { %s342_s27 = smov 4   ;;  %s42_s30 = sshll.u32 %s396_s2, 4  ;;  %s43_s30 = int_to_ptr.hbm [resolvable:$true] %s42_s30 }
   0x8   :  { %24 = dma.hbm_to_vmem [thread:$0]  %s17_s22, 128, %s19_s26, [#allocation4], %s341_s1, %s341_s1, %s342_s27  }
   0x9   :  { %s343_s5 = smov [#allocation8]  }
   0xa   :  { %s44_s0 = sshll.u32 %s343_s5, 4  ;;  %s45_s0 = int_to_ptr.vmem [resolvable:$true] %s44_s0 }
   0xb   :  { %50 = dma.hbm_to_vmem [thread:$0]  %s43_s30, 2048, %s45_s0, [#allocation7], %s338_s23, %s338_s23, %s339_s24  }
   0xc   :  { %331 = dma.done.wait [#allocation4], 128  }
   0xd   :  { %332 = vsyncadd [#allocation4], 4294967168 }
   0xe   :  { %333 = dma.done.wait [#allocation7], 4096  }
   0xf   :  { %334 = vsyncadd [#allocation7], 4294963200  ;;  %v92_v0 = vld [vmem:[#allocation6 + $0x78] sm:$0xff]  ;;  %v91_v1 = vld [vmem:[#allocation6 + $0x70] sm:$0xff]  ;;  %s344_s7 = smov [#allocation9]   ;;  %s176_s11 = sshll.u32 %s398_s4, 4  ;;  %s177_s11 = int_to_ptr.hbm [resolvable:$true] %s176_s11 }
  0x10   :  { %194 = vmatpush.msra.mxu2 %v92_v0  ;;  %93 = vmatpush.msra.mxu0 %v92_v0  ;;  %v90_v2 = vld [vmem:[#allocation6 + $0x68] sm:$0xff]  ;;  %v89_v3 = vld [vmem:[#allocation6 + $0x60] sm:$0xff]  ;;  %v140_v4 = vld [vmem:[#allocation8 + $0x78] sm:$0xff]  ;;  %s174_s8 = sshll.u32 %s344_s7, 4  ;;  %s175_s8 = int_to_ptr.vmem [resolvable:$true] %s174_s8 }
  0x11   :  { %v88_v5 = vld [vmem:[#allocation6 + $0x58] sm:$0xff]  ;;  %210 = vmatpush.msra.mxu3 %v140_v4  ;;  %v139_v6 = vld [vmem:[#allocation8 + $0x70] sm:$0xff]  ;;  %145 = vmatpush.msra.mxu1 %v140_v4  ;;  %v138_v7 = vld [vmem:[#allocation8 + $0x68] sm:$0xff] }
  0x12   :  { %195 = vmatpush.msra.mxu2 %v91_v1  ;;  %94 = vmatpush.msra.mxu0 %v91_v1  ;;  %v87_v8 = vld [vmem:[#allocation6 + $0x50] sm:$0xff]  ;;  %v137_v9 = vld [vmem:[#allocation8 + $0x60] sm:$0xff]  ;;  %v86_v10 = vld [vmem:[#allocation6 + $0x48] sm:$0xff] }
  0x13   :  { %211 = vmatpush.msra.mxu3 %v139_v6  ;;  %146 = vmatpush.msra.mxu1 %v139_v6  ;;  %v136_v11 = vld [vmem:[#allocation8 + $0x58] sm:$0xff]  ;;  %v85_v12 = vld [vmem:[#allocation6 + $0x40] sm:$0xff]  ;;  %v135_v13 = vld [vmem:[#allocation8 + $0x50] sm:$0xff] }
  0x14   :  { %196 = vmatpush.msra.mxu2 %v90_v2  ;;  %95 = vmatpush.msra.mxu0 %v90_v2  ;;  %v84_v14 = vld [vmem:[#allocation6 + $0x38] sm:$0xff]  ;;  %v134_v15 = vld [vmem:[#allocation8 + $0x48] sm:$0xff]  ;;  %v83_v16 = vld [vmem:[#allocation6 + $0x30] sm:$0xff] }
  0x15   :  { %212 = vmatpush.msra.mxu3 %v138_v7  ;;  %147 = vmatpush.msra.mxu1 %v138_v7  ;;  %v133_v17 = vld [vmem:[#allocation8 + $0x40] sm:$0xff]  ;;  %v82_v18 = vld [vmem:[#allocation6 + $0x28] sm:$0xff]  ;;  %v132_v19 = vld [vmem:[#allocation8 + $0x38] sm:$0xff] }
  0x16   :  { %197 = vmatpush.msra.mxu2 %v89_v3  ;;  %96 = vmatpush.msra.mxu0 %v89_v3  ;;  %v81_v20 = vld [vmem:[#allocation6 + $0x20] sm:$0xff]  ;;  %v131_v21 = vld [vmem:[#allocation8 + $0x30] sm:$0xff]  ;;  %v80_v22 = vld [vmem:[#allocation6 + $0x18] sm:$0xff] }
  0x17   :  { %213 = vmatpush.msra.mxu3 %v137_v9  ;;  %148 = vmatpush.msra.mxu1 %v137_v9  ;;  %v130_v23 = vld [vmem:[#allocation8 + $0x28] sm:$0xff]  ;;  %v79_v24 = vld [vmem:[#allocation6 + $0x10] sm:$0xff]  ;;  %v191_v25 = vld [vmem:[#allocation3] sm:$0xff]  }
  0x18   :  { %198 = vmatpush.msra.mxu2 %v88_v5  ;;  %97 = vmatpush.msra.mxu0 %v88_v5  ;;  %v129_v26 = vld [vmem:[#allocation8 + $0x20] sm:$0xff]  ;;  %v78_v27 = vld [vmem:[#allocation6 + $0x8] sm:$0xff]  ;;  %v128_v28 = vld [vmem:[#allocation8 + $0x18] sm:$0xff]  ;;  %v193_v30 = vunpack.c.h.bf16 %v191_v25  ;;  %v192_v31 = vunpack.c.l.bf16 %v191_v25 }
  0x19   :  { %214 = vmatpush.msra.mxu3 %v136_v11  ;;  %149 = vmatpush.msra.mxu1 %v136_v11  ;;  %v77_v29 = vld [vmem:[#allocation6] sm:$0xff]  ;;  %v127_v32 = vld [vmem:[#allocation8 + $0x10] sm:$0xff]  ;;  %v126_v33 = vld [vmem:[#allocation8 + $0x8] sm:$0xff] }
  0x1a   :  { %199 = vmatpush.msra.mxu2 %v87_v8  ;;  %98 = vmatpush.msra.mxu0 %v87_v8  ;;  %v125_v34 = vld [vmem:[#allocation8] sm:$0xff]  ;;  %v234_v37 = vld [vmem:[%s397_s3] ss:$0 sm:$0xff] }
  0x1b   :  { %215 = vmatpush.msra.mxu3 %v135_v13  ;;  %150 = vmatpush.msra.mxu1 %v135_v13 }
  0x1c   :  { %200 = vmatpush.msra.mxu2 %v86_v10  ;;  %99 = vmatpush.msra.mxu0 %v86_v10 }
  0x1d   :  { %216 = vmatpush.msra.mxu3 %v134_v15  ;;  %151 = vmatpush.msra.mxu1 %v134_v15 }
  0x1e   :  { %201 = vmatpush.msra.mxu2 %v85_v12  ;;  %100 = vmatpush.msra.mxu0 %v85_v12 }
  0x1f   :  { %217 = vmatpush.msra.mxu3 %v133_v17  ;;  %152 = vmatpush.msra.mxu1 %v133_v17 }
  0x20   :  { %202 = vmatpush.msra.mxu2 %v84_v14  ;;  %101 = vmatpush.msra.mxu0 %v84_v14 }
  0x21   :  { %218 = vmatpush.msra.mxu3 %v132_v19  ;;  %153 = vmatpush.msra.mxu1 %v132_v19 }
  0x22   :  { %203 = vmatpush.msra.mxu2 %v83_v16  ;;  %102 = vmatpush.msra.mxu0 %v83_v16 }
  0x23   :  { %219 = vmatpush.msra.mxu3 %v131_v21  ;;  %154 = vmatpush.msra.mxu1 %v131_v21 }
  0x24   :  { %204 = vmatpush.msra.mxu2 %v82_v18  ;;  %103 = vmatpush.msra.mxu0 %v82_v18 }
  0x25   :  { %220 = vmatpush.msra.mxu3 %v130_v23  ;;  %155 = vmatpush.msra.mxu1 %v130_v23 }
  0x26   :  { %205 = vmatpush.msra.mxu2 %v81_v20  ;;  %104 = vmatpush.msra.mxu0 %v81_v20 }
  0x27   :  { %221 = vmatpush.msra.mxu3 %v129_v26  ;;  %156 = vmatpush.msra.mxu1 %v129_v26 }
  0x28   :  { %206 = vmatpush.msra.mxu2 %v80_v22  ;;  %105 = vmatpush.msra.mxu0 %v80_v22 }
  0x29   :  { %222 = vmatpush.msra.mxu3 %v128_v28  ;;  %157 = vmatpush.msra.mxu1 %v128_v28 }
  0x2a   :  { %207 = vmatpush.msra.mxu2 %v79_v24  ;;  %106 = vmatpush.msra.mxu0 %v79_v24 }
  0x2b   :  { %223 = vmatpush.msra.mxu3 %v127_v32  ;;  %158 = vmatpush.msra.mxu1 %v127_v32 }
  0x2c   :  { %208 = vmatpush.msra.mxu2 %v78_v27  ;;  %107 = vmatpush.msra.mxu0 %v78_v27 }
  0x2d   :  { %224 = vmatpush.msra.mxu3 %v126_v33  ;;  %159 = vmatpush.msra.mxu1 %v126_v33 }
  0x2e   :  { %209 = vmatpush.msra.mxu2 %v77_v29  ;;  %108 = vmatpush.msra.mxu0 %v77_v29 }
  0x2f   :  { %112 = vmatmul.f32.vlgmr.msra.gmra.mxu2 %v193_v30  ;;  %109 = vmatmul.f32.vlgmr.msra.gmra.mxu0 %v192_v31 }
  0x30   :  { %225 = vmatpush.msra.mxu3 %v125_v34  ;;  %160 = vmatpush.msra.mxu1 %v125_v34 }
  0xac   :  { %v110_v35 = vpop.f32.mrf.mxu0 }
  0xad   :  { %161 = vmatmul.f32.vlgmr.msra.gmra.mxu1 %v110_v35 }
  0xb2   :  { %v113_v36 = vpop.f32.mrf.mxu2 }
  0xb3   :  { %164 = vmatmul.f32.vlgmr.msra.gmra.mxu3 %v113_v36 }
 0x12a   :  { %v162_v38 = vpop.f32.mrf.mxu1 }
 0x12b   :  { %v163_v39 = vadd.f32 %v234_v37, %v162_v38 }
 0x12d   :  { %168 = vst [vmem:[#allocation9] sm:$0xff] %v163_v39 }
 0x136   :  { %v165_v40 = vpop.f32.mrf.mxu3 }
 0x137   :  { %v166_v41 = vadd.f32 %v234_v37, %v165_v40 }
 0x139   :  { %169 = vst [vmem:[#allocation9 + $0x8] sm:$0xff] %v166_v41 }
 0x13a   :  { %182 = dma.vmem_to_hbm [thread:$0]  %s175_s8, 256, %s177_s11, [#allocation5], %s338_s23, %s338_s23, %s339_s24  }
 0x13b   :  { %335 = dma.done.wait [#allocation5], 256  }
 0x13c   :  { %336 = vsyncadd [#allocation5], 4294967040 }
 0x13d   :  { %187 = vsyncpa [#allocation4], 1 }
 0x13e   :  { %188 = vsyncpa [#allocation7], 1 }
 0x13f   :  { %189 = vsyncpa [#allocation5], 1 }

</bundles_post_ra>
